<compile_context>
chip_gen: v7x
topology: tpu7x:2x2x1
jax: 0.10.0
libtpu: 0.0.40
codegen_flags: <defaults>
</compile_context>

<pallas_src>
import math

import jax
import jax.numpy as jnp
import numpy as np
from jax.experimental import pallas as pl
from jax.experimental.pallas import tpu as pltpu


def _column_haar_matrix(W):
    """(W, W) matrix M = [pair-sum | pair-diff]: (y @ M)[:, j] = y[:,2j]+y[:,2j+1]
    for j < W/2 and y[:,2j']-y[:,2j'+1] for j = W/2 + j'.  Entries are 0/+-1."""
    hw = W // 2
    m = np.zeros((W, W), dtype=np.float32)
    j = np.arange(hw)
    m[2 * j, j] = 1.0
    m[2 * j + 1, j] = 1.0
    m[2 * j, hw + j] = 1.0
    m[2 * j + 1, hw + j] = -1.0
    return m


def _exact_dot(a, m):
    """f32-accurate matmul of f32 `a` with the 0/+-1 matrix `m`.

    `a` is split into three bf16-exact f32 slabs (a = hi + mid + lo exactly),
    so each MXU pass multiplies exactly-representable operands and the sum is
    accurate to f32 even if the hardware truncates matmul operands to bf16.
    """
    hi = a.astype(jnp.bfloat16).astype(jnp.float32)
    r1 = a - hi
    mid = r1.astype(jnp.bfloat16).astype(jnp.float32)
    lo = r1 - mid
    dot = lambda t: jnp.dot(t, m, preferred_element_type=jnp.float32)
    return dot(hi) + dot(mid) + dot(lo)


def _make_haar_kernel(bt, C, H, W):
    hh, hw = H // 2, W // 2

    def kernel(x2_ref, m_ref, o_ref):
        # x2_ref: (bt, C*hh, 2W)  row r = c*hh + i holds [x[c,2i,:], x[c,2i+1,:]]
        # m_ref : (W, W)          constant column-combination matrix
        # o_ref : (bt, 4C, hh, hw) output channel layout f*C + c
        m = m_ref[...]
        for bi in range(bt):                       # static, bt is small
            xr = x2_ref[bi]                        # (C*hh, 2W)
            top = xr[:, :W]                        # image rows 2i
            bot = xr[:, W:]                        # image rows 2i+1
            rs = (top + bot) * 0.25                # row-pair sum  (already /4)
            rd = (top - bot) * 0.25                # row-pair diff (already /4)
            ys = _exact_dot(rs, m)                 # [f0 | f1]  (C*hh, W)
            yd = _exact_dot(rd, m)                 # [f2 | f3]  (C*hh, W)
            for c in range(C):
                rows = slice(c * hh, (c + 1) * hh)
                o_ref[bi, 0 * C + c] = ys[rows, :hw]   # LL
                o_ref[bi, 1 * C + c] = ys[rows, hw:]   # LH (horizontal diff)
                o_ref[bi, 2 * C + c] = yd[rows, :hw]   # HL (vertical diff)
                o_ref[bi, 3 * C + c] = yd[rows, hw:]   # HH (diagonal diff)

    return kernel


def haar_downsampling(x, rev=False):
    """Forward pass of HaarDownsampling (channel_in = x.shape[1]) on TPU."""
    if rev:
        # TODO(synk): inverse path (reshape/transpose + conv_transpose2d) not implemented.
        raise NotImplementedError("HaarDownsampling rev=True path not implemented")

    B, C, H, W = x.shape
    assert H % 2 == 0 and W % 2 == 0, "H and W must be even"
    hh, hw = H // 2, W // 2
    x = x.astype(jnp.float32)

    # Free row-major reshape: row r = c*hh + i  ->  [x[c,2i,:], x[c,2i+1,:]].
    x2 = x.reshape(B, C * hh, 2 * W)
    m = jnp.asarray(_column_haar_matrix(W))

    # Batch-tile so each grid step moves a sizeable block (amortizes per-step
    # pipeline overhead) while the double-buffered in+out blocks stay well
    # inside the scoped VMEM budget on all chips (incl. v7x's 64 MiB).
    per_elem_bytes = C * H * W * 4
    budget = 2 << 20
    bt = 1
    for d in range(1, B + 1):
        if B % d == 0 and d * per_elem_bytes <= budget:
            bt = d
    grid = (B // bt,)

    kernel = _make_haar_kernel(bt, C, H, W)
    out = pl.pallas_call(
        kernel,
        out_shape=jax.ShapeDtypeStruct((B, 4 * C, hh, hw), jnp.float32),
        grid=grid,
        in_specs=[
            pl.BlockSpec((bt, C * hh, 2 * W), lambda i: (i, 0, 0)),
            pl.BlockSpec((W, W), lambda i: (0, 0)),   # constant, stays resident
        ],
        out_specs=pl.BlockSpec((bt, 4 * C, hh, hw), lambda i: (i, 0, 0, 0)),
        compiler_params=pltpu.CompilerParams(dimension_semantics=("parallel",)),
    )(x2, m)
    return out


def haar_jacobian(x_shape, rev=False):
    """log|det J| bookkeeping of the PyTorch module (self.last_jac)."""
    elements = x_shape[1] * x_shape[2] * x_shape[3]
    return elements / 4.0 * (math.log(16.0) if rev else math.log(1.0 / 16.0))


# ---------------------------------------------------------------------------
# Pure-JAX reference: closed form of the grouped 2x2 stride-2 Haar conv /4
# followed by the module's reshape/transpose (output channel = f*C + c).
# ---------------------------------------------------------------------------
def haar_downsampling_ref(x):
    a = x[:, :, 0::2, 0::2]
    b = x[:, :, 0::2, 1::2]
    c = x[:, :, 1::2, 0::2]
    d = x[:, :, 1::2, 1::2]
    f0 = (a + b + c + d) * 0.25
    f1 = (a - b + c - d) * 0.25
    f2 = (a + b - c - d) * 0.25
    f3 = (a - b - c + d) * 0.25
    return jnp.concatenate([f0, f1, f2, f3], axis=1)


if __name__ == "__main__":
    B, C, H, W = 2, 4, 16, 16
    key = jax.random.PRNGKey(0)
    x = jax.random.normal(key, (B, C, H, W), dtype=jnp.float32)

    out = haar_downsampling(x)
    out = jax.block_until_ready(out)

    ref = jax.block_until_ready(haar_downsampling_ref(x))

    assert out.shape == (B, 4 * C, H // 2, W // 2) and out.dtype == jnp.float32
    max_err = jnp.max(jnp.abs(out - ref))
    assert jnp.allclose(out, ref, atol=1e-5, rtol=1e-5), f"max abs err {max_err}"

    _ = haar_jacobian(x.shape)   # == C*H*W/4 * log(1/16), matches module.last_jac

    print("KERNEL_OK")
</pallas_src>

<mosaic_0001>
module attributes {stable_mosaic.version = 11 : i64} {
  func.func @kernel(%arg0: i32, %arg1: memref<2x32x32xf32, #tpu.memory_space<vmem>>, %arg2: memref<16x16xf32, #tpu.memory_space<vmem>>, %arg3: memref<2x16x8x8xf32, #tpu.memory_space<vmem>>) attributes {dimension_semantics = [#tpu.dimension_semantics<parallel>], iteration_bounds = array<i64: 1>, scalar_prefetch = 0 : i64, scratch_operands = 0 : i64, tpu.core_type = #tpu.core_type<tc>, window_params = [{transform_indices = @transform_0, window_bounds = array<i64: 2, 32, 32>}, {pipeline_mode = #tpu.pipeline_mode<synchronous>, transform_indices = @transform_1, window_bounds = array<i64: 16, 16>}, {transform_indices = @transform_2, window_bounds = array<i64: 2, 16, 8, 8>}]} {
    %c0 = arith.constant 0 : index
    %c0_0 = arith.constant 0 : index
    %0 = vector.load %arg2[%c0, %c0_0] : memref<16x16xf32, #tpu.memory_space<vmem>>, vector<16x16xf32>
    %c0_1 = arith.constant 0 : index
    %c0_2 = arith.constant 0 : index
    %c0_3 = arith.constant 0 : index
    %1 = vector.load %arg1[%c0_1, %c0_2, %c0_3] : memref<2x32x32xf32, #tpu.memory_space<vmem>>, vector<1x32x32xf32>
    %2 = vector.shape_cast %1 : vector<1x32x32xf32> to vector<32x32xf32>
    %3 = vector.extract_strided_slice %2 {offsets = [0, 0], sizes = [32, 16], strides = [1, 1]} : vector<32x32xf32> to vector<32x16xf32>
    %4 = vector.extract_strided_slice %2 {offsets = [0, 16], sizes = [32, 16], strides = [1, 1]} : vector<32x32xf32> to vector<32x16xf32>
    %5 = arith.addf %3, %4 : vector<32x16xf32>
    %cst = arith.constant 2.500000e-01 : f32
    %6 = vector.broadcast %cst : f32 to vector<32x16xf32>
    %7 = arith.mulf %5, %6 : vector<32x16xf32>
    %8 = arith.subf %3, %4 : vector<32x16xf32>
    %cst_4 = arith.constant 2.500000e-01 : f32
    %9 = vector.broadcast %cst_4 : f32 to vector<32x16xf32>
    %10 = arith.mulf %8, %9 : vector<32x16xf32>
    %11 = arith.truncf %7 : vector<32x16xf32> to vector<32x16xbf16>
    %12 = arith.extf %11 : vector<32x16xbf16> to vector<32x16xf32>
    %13 = arith.subf %7, %12 : vector<32x16xf32>
    %14 = arith.truncf %13 : vector<32x16xf32> to vector<32x16xbf16>
    %15 = arith.extf %14 : vector<32x16xbf16> to vector<32x16xf32>
    %16 = arith.subf %13, %15 : vector<32x16xf32>
    %cst_5 = arith.constant dense<0.000000e+00> : vector<32x16xf32>
    %17 = tpu.matmul %12, %0, %cst_5 {dimension_numbers = #tpu.dot_dimension_numbers<[1], [0], [0], [1], [0, 0, 1, 1], [], []>} : vector<32x16xf32>, vector<16x16xf32>, vector<32x16xf32> -> vector<32x16xf32>
    %cst_6 = arith.constant dense<0.000000e+00> : vector<32x16xf32>
    %18 = tpu.matmul %15, %0, %cst_6 {dimension_numbers = #tpu.dot_dimension_numbers<[1], [0], [0], [1], [0, 0, 1, 1], [], []>} : vector<32x16xf32>, vector<16x16xf32>, vector<32x16xf32> -> vector<32x16xf32>
    %19 = arith.addf %17, %18 : vector<32x16xf32>
    %cst_7 = arith.constant dense<0.000000e+00> : vector<32x16xf32>
    %20 = tpu.matmul %16, %0, %cst_7 {dimension_numbers = #tpu.dot_dimension_numbers<[1], [0], [0], [1], [0, 0, 1, 1], [], []>} : vector<32x16xf32>, vector<16x16xf32>, vector<32x16xf32> -> vector<32x16xf32>
    %21 = arith.addf %19, %20 : vector<32x16xf32>
    %22 = arith.truncf %10 : vector<32x16xf32> to vector<32x16xbf16>
    %23 = arith.extf %22 : vector<32x16xbf16> to vector<32x16xf32>
    %24 = arith.subf %10, %23 : vector<32x16xf32>
    %25 = arith.truncf %24 : vector<32x16xf32> to vector<32x16xbf16>
    %26 = arith.extf %25 : vector<32x16xbf16> to vector<32x16xf32>
    %27 = arith.subf %24, %26 : vector<32x16xf32>
    %cst_8 = arith.constant dense<0.000000e+00> : vector<32x16xf32>
    %28 = tpu.matmul %23, %0, %cst_8 {dimension_numbers = #tpu.dot_dimension_numbers<[1], [0], [0], [1], [0, 0, 1, 1], [], []>} : vector<32x16xf32>, vector<16x16xf32>, vector<32x16xf32> -> vector<32x16xf32>
    %cst_9 = arith.constant dense<0.000000e+00> : vector<32x16xf32>
    %29 = tpu.matmul %26, %0, %cst_9 {dimension_numbers = #tpu.dot_dimension_numbers<[1], [0], [0], [1], [0, 0, 1, 1], [], []>} : vector<32x16xf32>, vector<16x16xf32>, vector<32x16xf32> -> vector<32x16xf32>
    %30 = arith.addf %28, %29 : vector<32x16xf32>
    %cst_10 = arith.constant dense<0.000000e+00> : vector<32x16xf32>
    %31 = tpu.matmul %27, %0, %cst_10 {dimension_numbers = #tpu.dot_dimension_numbers<[1], [0], [0], [1], [0, 0, 1, 1], [], []>} : vector<32x16xf32>, vector<16x16xf32>, vector<32x16xf32> -> vector<32x16xf32>
    %32 = arith.addf %30, %31 : vector<32x16xf32>
    %33 = vector.extract_strided_slice %21 {offsets = [0, 0], sizes = [8, 8], strides = [1, 1]} : vector<32x16xf32> to vector<8x8xf32>
    %c0_11 = arith.constant 0 : index
    %c0_12 = arith.constant 0 : index
    %c0_13 = arith.constant 0 : index
    %c0_14 = arith.constant 0 : index
    %34 = vector.load %arg3[%c0_11, %c0_12, %c0_13, %c0_14] : memref<2x16x8x8xf32, #tpu.memory_space<vmem>>, vector<1x1x8x8xf32>
    %35 = vector.shape_cast %34 : vector<1x1x8x8xf32> to vector<8x8xf32>
    %36 = vector.shape_cast %33 : vector<8x8xf32> to vector<1x1x8x8xf32>
    tpu.vector_store %arg3[%c0_11, %c0_12, %c0_13, %c0_14], %36 {strides = array<i32>} : memref<2x16x8x8xf32, #tpu.memory_space<vmem>>, vector<1x1x8x8xf32>,
    %37 = vector.extract_strided_slice %21 {offsets = [0, 8], sizes = [8, 8], strides = [1, 1]} : vector<32x16xf32> to vector<8x8xf32>
    %c0_15 = arith.constant 0 : index
    %c4 = arith.constant 4 : index
    %c0_16 = arith.constant 0 : index
    %c0_17 = arith.constant 0 : index
    %38 = vector.load %arg3[%c0_15, %c4, %c0_16, %c0_17] : memref<2x16x8x8xf32, #tpu.memory_space<vmem>>, vector<1x1x8x8xf32>
    %39 = vector.shape_cast %38 : vector<1x1x8x8xf32> to vector<8x8xf32>
    %40 = vector.shape_cast %37 : vector<8x8xf32> to vector<1x1x8x8xf32>
    tpu.vector_store %arg3[%c0_15, %c4, %c0_16, %c0_17], %40 {strides = array<i32>} : memref<2x16x8x8xf32, #tpu.memory_space<vmem>>, vector<1x1x8x8xf32>,
    %41 = vector.extract_strided_slice %32 {offsets = [0, 0], sizes = [8, 8], strides = [1, 1]} : vector<32x16xf32> to vector<8x8xf32>
    %c0_18 = arith.constant 0 : index
    %c8 = arith.constant 8 : index
    %c0_19 = arith.constant 0 : index
    %c0_20 = arith.constant 0 : index
    %42 = vector.load %arg3[%c0_18, %c8, %c0_19, %c0_20] : memref<2x16x8x8xf32, #tpu.memory_space<vmem>>, vector<1x1x8x8xf32>
    %43 = vector.shape_cast %42 : vector<1x1x8x8xf32> to vector<8x8xf32>
    %44 = vector.shape_cast %41 : vector<8x8xf32> to vector<1x1x8x8xf32>
    tpu.vector_store %arg3[%c0_18, %c8, %c0_19, %c0_20], %44 {strides = array<i32>} : memref<2x16x8x8xf32, #tpu.memory_space<vmem>>, vector<1x1x8x8xf32>,
    %45 = vector.extract_strided_slice %32 {offsets = [0, 8], sizes = [8, 8], strides = [1, 1]} : vector<32x16xf32> to vector<8x8xf32>
    %c0_21 = arith.constant 0 : index
    %c12 = arith.constant 12 : index
    %c0_22 = arith.constant 0 : index
    %c0_23 = arith.constant 0 : index
    %46 = vector.load %arg3[%c0_21, %c12, %c0_22, %c0_23] : memref<2x16x8x8xf32, #tpu.memory_space<vmem>>, vector<1x1x8x8xf32>
    %47 = vector.shape_cast %46 : vector<1x1x8x8xf32> to vector<8x8xf32>
    %48 = vector.shape_cast %45 : vector<8x8xf32> to vector<1x1x8x8xf32>
    tpu.vector_store %arg3[%c0_21, %c12, %c0_22, %c0_23], %48 {strides = array<i32>} : memref<2x16x8x8xf32, #tpu.memory_space<vmem>>, vector<1x1x8x8xf32>,
    %49 = vector.extract_strided_slice %21 {offsets = [8, 0], sizes = [8, 8], strides = [1, 1]} : vector<32x16xf32> to vector<8x8xf32>
    %c0_24 = arith.constant 0 : index
    %c1 = arith.constant 1 : index
    %c0_25 = arith.constant 0 : index
    %c0_26 = arith.constant 0 : index
    %50 = vector.load %arg3[%c0_24, %c1, %c0_25, %c0_26] : memref<2x16x8x8xf32, #tpu.memory_space<vmem>>, vector<1x1x8x8xf32>
    %51 = vector.shape_cast %50 : vector<1x1x8x8xf32> to vector<8x8xf32>
    %52 = vector.shape_cast %49 : vector<8x8xf32> to vector<1x1x8x8xf32>
    tpu.vector_store %arg3[%c0_24, %c1, %c0_25, %c0_26], %52 {strides = array<i32>} : memref<2x16x8x8xf32, #tpu.memory_space<vmem>>, vector<1x1x8x8xf32>,
    %53 = vector.extract_strided_slice %21 {offsets = [8, 8], sizes = [8, 8], strides = [1, 1]} : vector<32x16xf32> to vector<8x8xf32>
    %c0_27 = arith.constant 0 : index
    %c5 = arith.constant 5 : index
    %c0_28 = arith.constant 0 : index
    %c0_29 = arith.constant 0 : index
    %54 = vector.load %arg3[%c0_27, %c5, %c0_28, %c0_29] : memref<2x16x8x8xf32, #tpu.memory_space<vmem>>, vector<1x1x8x8xf32>
    %55 = vector.shape_cast %54 : vector<1x1x8x8xf32> to vector<8x8xf32>
    %56 = vector.shape_cast %53 : vector<8x8xf32> to vector<1x1x8x8xf32>
    tpu.vector_store %arg3[%c0_27, %c5, %c0_28, %c0_29], %56 {strides = array<i32>} : memref<2x16x8x8xf32, #tpu.memory_space<vmem>>, vector<1x1x8x8xf32>,
    %57 = vector.extract_strided_slice %32 {offsets = [8, 0], sizes = [8, 8], strides = [1, 1]} : vector<32x16xf32> to vector<8x8xf32>
    %c0_30 = arith.constant 0 : index
    %c9 = arith.constant 9 : index
    %c0_31 = arith.constant 0 : index
    %c0_32 = arith.constant 0 : index
    %58 = vector.load %arg3[%c0_30, %c9, %c0_31, %c0_32] : memref<2x16x8x8xf32, #tpu.memory_space<vmem>>, vector<1x1x8x8xf32>
    %59 = vector.shape_cast %58 : vector<1x1x8x8xf32> to vector<8x8xf32>
    %60 = vector.shape_cast %57 : vector<8x8xf32> to vector<1x1x8x8xf32>
    tpu.vector_store %arg3[%c0_30, %c9, %c0_31, %c0_32], %60 {strides = array<i32>} : memref<2x16x8x8xf32, #tpu.memory_space<vmem>>, vector<1x1x8x8xf32>,
    %61 = vector.extract_strided_slice %32 {offsets = [8, 8], sizes = [8, 8], strides = [1, 1]} : vector<32x16xf32> to vector<8x8xf32>
    %c0_33 = arith.constant 0 : index
    %c13 = arith.constant 13 : index
    %c0_34 = arith.constant 0 : index
    %c0_35 = arith.constant 0 : index
    %62 = vector.load %arg3[%c0_33, %c13, %c0_34, %c0_35] : memref<2x16x8x8xf32, #tpu.memory_space<vmem>>, vector<1x1x8x8xf32>
    %63 = vector.shape_cast %62 : vector<1x1x8x8xf32> to vector<8x8xf32>
    %64 = vector.shape_cast %61 : vector<8x8xf32> to vector<1x1x8x8xf32>
    tpu.vector_store %arg3[%c0_33, %c13, %c0_34, %c0_35], %64 {strides = array<i32>} : memref<2x16x8x8xf32, #tpu.memory_space<vmem>>, vector<1x1x8x8xf32>,
    %65 = vector.extract_strided_slice %21 {offsets = [16, 0], sizes = [8, 8], strides = [1, 1]} : vector<32x16xf32> to vector<8x8xf32>
    %c0_36 = arith.constant 0 : index
    %c2 = arith.constant 2 : index
    %c0_37 = arith.constant 0 : index
    %c0_38 = arith.constant 0 : index
    %66 = vector.load %arg3[%c0_36, %c2, %c0_37, %c0_38] : memref<2x16x8x8xf32, #tpu.memory_space<vmem>>, vector<1x1x8x8xf32>
    %67 = vector.shape_cast %66 : vector<1x1x8x8xf32> to vector<8x8xf32>
    %68 = vector.shape_cast %65 : vector<8x8xf32> to vector<1x1x8x8xf32>
    tpu.vector_store %arg3[%c0_36, %c2, %c0_37, %c0_38], %68 {strides = array<i32>} : memref<2x16x8x8xf32, #tpu.memory_space<vmem>>, vector<1x1x8x8xf32>,
    %69 = vector.extract_strided_slice %21 {offsets = [16, 8], sizes = [8, 8], strides = [1, 1]} : vector<32x16xf32> to vector<8x8xf32>
    %c0_39 = arith.constant 0 : index
    %c6 = arith.constant 6 : index
    %c0_40 = arith.constant 0 : index
    %c0_41 = arith.constant 0 : index
    %70 = vector.load %arg3[%c0_39, %c6, %c0_40, %c0_41] : memref<2x16x8x8xf32, #tpu.memory_space<vmem>>, vector<1x1x8x8xf32>
    %71 = vector.shape_cast %70 : vector<1x1x8x8xf32> to vector<8x8xf32>
    %72 = vector.shape_cast %69 : vector<8x8xf32> to vector<1x1x8x8xf32>
    tpu.vector_store %arg3[%c0_39, %c6, %c0_40, %c0_41], %72 {strides = array<i32>} : memref<2x16x8x8xf32, #tpu.memory_space<vmem>>, vector<1x1x8x8xf32>,
    %73 = vector.extract_strided_slice %32 {offsets = [16, 0], sizes = [8, 8], strides = [1, 1]} : vector<32x16xf32> to vector<8x8xf32>
    %c0_42 = arith.constant 0 : index
    %c10 = arith.constant 10 : index
    %c0_43 = arith.constant 0 : index
    %c0_44 = arith.constant 0 : index
    %74 = vector.load %arg3[%c0_42, %c10, %c0_43, %c0_44] : memref<2x16x8x8xf32, #tpu.memory_space<vmem>>, vector<1x1x8x8xf32>
    %75 = vector.shape_cast %74 : vector<1x1x8x8xf32> to vector<8x8xf32>
    %76 = vector.shape_cast %73 : vector<8x8xf32> to vector<1x1x8x8xf32>
    tpu.vector_store %arg3[%c0_42, %c10, %c0_43, %c0_44], %76 {strides = array<i32>} : memref<2x16x8x8xf32, #tpu.memory_space<vmem>>, vector<1x1x8x8xf32>,
    %77 = vector.extract_strided_slice %32 {offsets = [16, 8], sizes = [8, 8], strides = [1, 1]} : vector<32x16xf32> to vector<8x8xf32>
    %c0_45 = arith.constant 0 : index
    %c14 = arith.constant 14 : index
    %c0_46 = arith.constant 0 : index
    %c0_47 = arith.constant 0 : index
    %78 = vector.load %arg3[%c0_45, %c14, %c0_46, %c0_47] : memref<2x16x8x8xf32, #tpu.memory_space<vmem>>, vector<1x1x8x8xf32>
    %79 = vector.shape_cast %78 : vector<1x1x8x8xf32> to vector<8x8xf32>
    %80 = vector.shape_cast %77 : vector<8x8xf32> to vector<1x1x8x8xf32>
    tpu.vector_store %arg3[%c0_45, %c14, %c0_46, %c0_47], %80 {strides = array<i32>} : memref<2x16x8x8xf32, #tpu.memory_space<vmem>>, vector<1x1x8x8xf32>,
    %81 = vector.extract_strided_slice %21 {offsets = [24, 0], sizes = [8, 8], strides = [1, 1]} : vector<32x16xf32> to vector<8x8xf32>
    %c0_48 = arith.constant 0 : index
    %c3 = arith.constant 3 : index
    %c0_49 = arith.constant 0 : index
    %c0_50 = arith.constant 0 : index
    %82 = vector.load %arg3[%c0_48, %c3, %c0_49, %c0_50] : memref<2x16x8x8xf32, #tpu.memory_space<vmem>>, vector<1x1x8x8xf32>
    %83 = vector.shape_cast %82 : vector<1x1x8x8xf32> to vector<8x8xf32>
    %84 = vector.shape_cast %81 : vector<8x8xf32> to vector<1x1x8x8xf32>
    tpu.vector_store %arg3[%c0_48, %c3, %c0_49, %c0_50], %84 {strides = array<i32>} : memref<2x16x8x8xf32, #tpu.memory_space<vmem>>, vector<1x1x8x8xf32>,
    %85 = vector.extract_strided_slice %21 {offsets = [24, 8], sizes = [8, 8], strides = [1, 1]} : vector<32x16xf32> to vector<8x8xf32>
    %c0_51 = arith.constant 0 : index
    %c7 = arith.constant 7 : index
    %c0_52 = arith.constant 0 : index
    %c0_53 = arith.constant 0 : index
    %86 = vector.load %arg3[%c0_51, %c7, %c0_52, %c0_53] : memref<2x16x8x8xf32, #tpu.memory_space<vmem>>, vector<1x1x8x8xf32>
    %87 = vector.shape_cast %86 : vector<1x1x8x8xf32> to vector<8x8xf32>
    %88 = vector.shape_cast %85 : vector<8x8xf32> to vector<1x1x8x8xf32>
    tpu.vector_store %arg3[%c0_51, %c7, %c0_52, %c0_53], %88 {strides = array<i32>} : memref<2x16x8x8xf32, #tpu.memory_space<vmem>>, vector<1x1x8x8xf32>,
    %89 = vector.extract_strided_slice %32 {offsets = [24, 0], sizes = [8, 8], strides = [1, 1]} : vector<32x16xf32> to vector<8x8xf32>
    %c0_54 = arith.constant 0 : index
    %c11 = arith.constant 11 : index
    %c0_55 = arith.constant 0 : index
    %c0_56 = arith.constant 0 : index
    %90 = vector.load %arg3[%c0_54, %c11, %c0_55, %c0_56] : memref<2x16x8x8xf32, #tpu.memory_space<vmem>>, vector<1x1x8x8xf32>
    %91 = vector.shape_cast %90 : vector<1x1x8x8xf32> to vector<8x8xf32>
    %92 = vector.shape_cast %89 : vector<8x8xf32> to vector<1x1x8x8xf32>
    tpu.vector_store %arg3[%c0_54, %c11, %c0_55, %c0_56], %92 {strides = array<i32>} : memref<2x16x8x8xf32, #tpu.memory_space<vmem>>, vector<1x1x8x8xf32>,
    %93 = vector.extract_strided_slice %32 {offsets = [24, 8], sizes = [8, 8], strides = [1, 1]} : vector<32x16xf32> to vector<8x8xf32>
    %c0_57 = arith.constant 0 : index
    %c15 = arith.constant 15 : index
    %c0_58 = arith.constant 0 : index
    %c0_59 = arith.constant 0 : index
    %94 = vector.load %arg3[%c0_57, %c15, %c0_58, %c0_59] : memref<2x16x8x8xf32, #tpu.memory_space<vmem>>, vector<1x1x8x8xf32>
    %95 = vector.shape_cast %94 : vector<1x1x8x8xf32> to vector<8x8xf32>
    %96 = vector.shape_cast %93 : vector<8x8xf32> to vector<1x1x8x8xf32>
    tpu.vector_store %arg3[%c0_57, %c15, %c0_58, %c0_59], %96 {strides = array<i32>} : memref<2x16x8x8xf32, #tpu.memory_space<vmem>>, vector<1x1x8x8xf32>,
    %c1_60 = arith.constant 1 : index
    %c0_61 = arith.constant 0 : index
    %c0_62 = arith.constant 0 : index
    %97 = vector.load %arg1[%c1_60, %c0_61, %c0_62] : memref<2x32x32xf32, #tpu.memory_space<vmem>>, vector<1x32x32xf32>
    %98 = vector.shape_cast %97 : vector<1x32x32xf32> to vector<32x32xf32>
    %99 = vector.extract_strided_slice %98 {offsets = [0, 0], sizes = [32, 16], strides = [1, 1]} : vector<32x32xf32> to vector<32x16xf32>
    %100 = vector.extract_strided_slice %98 {offsets = [0, 16], sizes = [32, 16], strides = [1, 1]} : vector<32x32xf32> to vector<32x16xf32>
    %101 = arith.addf %99, %100 : vector<32x16xf32>
    %cst_63 = arith.constant 2.500000e-01 : f32
    %102 = vector.broadcast %cst_63 : f32 to vector<32x16xf32>
    %103 = arith.mulf %101, %102 : vector<32x16xf32>
    %104 = arith.subf %99, %100 : vector<32x16xf32>
    %cst_64 = arith.constant 2.500000e-01 : f32
    %105 = vector.broadcast %cst_64 : f32 to vector<32x16xf32>
    %106 = arith.mulf %104, %105 : vector<32x16xf32>
    %107 = arith.truncf %103 : vector<32x16xf32> to vector<32x16xbf16>
    %108 = arith.extf %107 : vector<32x16xbf16> to vector<32x16xf32>
    %109 = arith.subf %103, %108 : vector<32x16xf32>
    %110 = arith.truncf %109 : vector<32x16xf32> to vector<32x16xbf16>
    %111 = arith.extf %110 : vector<32x16xbf16> to vector<32x16xf32>
    %112 = arith.subf %109, %111 : vector<32x16xf32>
    %cst_65 = arith.constant dense<0.000000e+00> : vector<32x16xf32>
    %113 = tpu.matmul %108, %0, %cst_65 {dimension_numbers = #tpu.dot_dimension_numbers<[1], [0], [0], [1], [0, 0, 1, 1], [], []>} : vector<32x16xf32>, vector<16x16xf32>, vector<32x16xf32> -> vector<32x16xf32>
    %cst_66 = arith.constant dense<0.000000e+00> : vector<32x16xf32>
    %114 = tpu.matmul %111, %0, %cst_66 {dimension_numbers = #tpu.dot_dimension_numbers<[1], [0], [0], [1], [0, 0, 1, 1], [], []>} : vector<32x16xf32>, vector<16x16xf32>, vector<32x16xf32> -> vector<32x16xf32>
    %115 = arith.addf %113, %114 : vector<32x16xf32>
    %cst_67 = arith.constant dense<0.000000e+00> : vector<32x16xf32>
    %116 = tpu.matmul %112, %0, %cst_67 {dimension_numbers = #tpu.dot_dimension_numbers<[1], [0], [0], [1], [0, 0, 1, 1], [], []>} : vector<32x16xf32>, vector<16x16xf32>, vector<32x16xf32> -> vector<32x16xf32>
    %117 = arith.addf %115, %116 : vector<32x16xf32>
    %118 = arith.truncf %106 : vector<32x16xf32> to vector<32x16xbf16>
    %119 = arith.extf %118 : vector<32x16xbf16> to vector<32x16xf32>
    %120 = arith.subf %106, %119 : vector<32x16xf32>
    %121 = arith.truncf %120 : vector<32x16xf32> to vector<32x16xbf16>
    %122 = arith.extf %121 : vector<32x16xbf16> to vector<32x16xf32>
    %123 = arith.subf %120, %122 : vector<32x16xf32>
    %cst_68 = arith.constant dense<0.000000e+00> : vector<32x16xf32>
    %124 = tpu.matmul %119, %0, %cst_68 {dimension_numbers = #tpu.dot_dimension_numbers<[1], [0], [0], [1], [0, 0, 1, 1], [], []>} : vector<32x16xf32>, vector<16x16xf32>, vector<32x16xf32> -> vector<32x16xf32>
    %cst_69 = arith.constant dense<0.000000e+00> : vector<32x16xf32>
    %125 = tpu.matmul %122, %0, %cst_69 {dimension_numbers = #tpu.dot_dimension_numbers<[1], [0], [0], [1], [0, 0, 1, 1], [], []>} : vector<32x16xf32>, vector<16x16xf32>, vector<32x16xf32> -> vector<32x16xf32>
    %126 = arith.addf %124, %125 : vector<32x16xf32>
    %cst_70 = arith.constant dense<0.000000e+00> : vector<32x16xf32>
    %127 = tpu.matmul %123, %0, %cst_70 {dimension_numbers = #tpu.dot_dimension_numbers<[1], [0], [0], [1], [0, 0, 1, 1], [], []>} : vector<32x16xf32>, vector<16x16xf32>, vector<32x16xf32> -> vector<32x16xf32>
    %128 = arith.addf %126, %127 : vector<32x16xf32>
    %129 = vector.extract_strided_slice %117 {offsets = [0, 0], sizes = [8, 8], strides = [1, 1]} : vector<32x16xf32> to vector<8x8xf32>
    %c1_71 = arith.constant 1 : index
    %c0_72 = arith.constant 0 : index
    %c0_73 = arith.constant 0 : index
    %c0_74 = arith.constant 0 : index
    %130 = vector.load %arg3[%c1_71, %c0_72, %c0_73, %c0_74] : memref<2x16x8x8xf32, #tpu.memory_space<vmem>>, vector<1x1x8x8xf32>
    %131 = vector.shape_cast %130 : vector<1x1x8x8xf32> to vector<8x8xf32>
    %132 = vector.shape_cast %129 : vector<8x8xf32> to vector<1x1x8x8xf32>
    tpu.vector_store %arg3[%c1_71, %c0_72, %c0_73, %c0_74], %132 {strides = array<i32>} : memref<2x16x8x8xf32, #tpu.memory_space<vmem>>, vector<1x1x8x8xf32>,
    %133 = vector.extract_strided_slice %117 {offsets = [0, 8], sizes = [8, 8], strides = [1, 1]} : vector<32x16xf32> to vector<8x8xf32>
    %c1_75 = arith.constant 1 : index
    %c4_76 = arith.constant 4 : index
    %c0_77 = arith.constant 0 : index
    %c0_78 = arith.constant 0 : index
    %134 = vector.load %arg3[%c1_75, %c4_76, %c0_77, %c0_78] : memref<2x16x8x8xf32, #tpu.memory_space<vmem>>, vector<1x1x8x8xf32>
    %135 = vector.shape_cast %134 : vector<1x1x8x8xf32> to vector<8x8xf32>
    %136 = vector.shape_cast %133 : vector<8x8xf32> to vector<1x1x8x8xf32>
    tpu.vector_store %arg3[%c1_75, %c4_76, %c0_77, %c0_78], %136 {strides = array<i32>} : memref<2x16x8x8xf32, #tpu.memory_space<vmem>>, vector<1x1x8x8xf32>,
    %137 = vector.extract_strided_slice %128 {offsets = [0, 0], sizes = [8, 8], strides = [1, 1]} : vector<32x16xf32> to vector<8x8xf32>
    %c1_79 = arith.constant 1 : index
    %c8_80 = arith.constant 8 : index
    %c0_81 = arith.constant 0 : index
    %c0_82 = arith.constant 0 : index
    %138 = vector.load %arg3[%c1_79, %c8_80, %c0_81, %c0_82] : memref<2x16x8x8xf32, #tpu.memory_space<vmem>>, vector<1x1x8x8xf32>
    %139 = vector.shape_cast %138 : vector<1x1x8x8xf32> to vector<8x8xf32>
    %140 = vector.shape_cast %137 : vector<8x8xf32> to vector<1x1x8x8xf32>
    tpu.vector_store %arg3[%c1_79, %c8_80, %c0_81, %c0_82], %140 {strides = array<i32>} : memref<2x16x8x8xf32, #tpu.memory_space<vmem>>, vector<1x1x8x8xf32>,
    %141 = vector.extract_strided_slice %128 {offsets = [0, 8], sizes = [8, 8], strides = [1, 1]} : vector<32x16xf32> to vector<8x8xf32>
    %c1_83 = arith.constant 1 : index
    %c12_84 = arith.constant 12 : index
    %c0_85 = arith.constant 0 : index
    %c0_86 = arith.constant 0 : index
    %142 = vector.load %arg3[%c1_83, %c12_84, %c0_85, %c0_86] : memref<2x16x8x8xf32, #tpu.memory_space<vmem>>, vector<1x1x8x8xf32>
    %143 = vector.shape_cast %142 : vector<1x1x8x8xf32> to vector<8x8xf32>
    %144 = vector.shape_cast %141 : vector<8x8xf32> to vector<1x1x8x8xf32>
    tpu.vector_store %arg3[%c1_83, %c12_84, %c0_85, %c0_86], %144 {strides = array<i32>} : memref<2x16x8x8xf32, #tpu.memory_space<vmem>>, vector<1x1x8x8xf32>,
    %145 = vector.extract_strided_slice %117 {offsets = [8, 0], sizes = [8, 8], strides = [1, 1]} : vector<32x16xf32> to vector<8x8xf32>
    %c1_87 = arith.constant 1 : index
    %c1_88 = arith.constant 1 : index
    %c0_89 = arith.constant 0 : index
    %c0_90 = arith.constant 0 : index
    %146 = vector.load %arg3[%c1_87, %c1_88, %c0_89, %c0_90] : memref<2x16x8x8xf32, #tpu.memory_space<vmem>>, vector<1x1x8x8xf32>
    %147 = vector.shape_cast %146 : vector<1x1x8x8xf32> to vector<8x8xf32>
    %148 = vector.shape_cast %145 : vector<8x8xf32> to vector<1x1x8x8xf32>
    tpu.vector_store %arg3[%c1_87, %c1_88, %c0_89, %c0_90], %148 {strides = array<i32>} : memref<2x16x8x8xf32, #tpu.memory_space<vmem>>, vector<1x1x8x8xf32>,
    %149 = vector.extract_strided_slice %117 {offsets = [8, 8], sizes = [8, 8], strides = [1, 1]} : vector<32x16xf32> to vector<8x8xf32>
    %c1_91 = arith.constant 1 : index
    %c5_92 = arith.constant 5 : index
    %c0_93 = arith.constant 0 : index
    %c0_94 = arith.constant 0 : index
    %150 = vector.load %arg3[%c1_91, %c5_92, %c0_93, %c0_94] : memref<2x16x8x8xf32, #tpu.memory_space<vmem>>, vector<1x1x8x8xf32>
    %151 = vector.shape_cast %150 : vector<1x1x8x8xf32> to vector<8x8xf32>
    %152 = vector.shape_cast %149 : vector<8x8xf32> to vector<1x1x8x8xf32>
    tpu.vector_store %arg3[%c1_91, %c5_92, %c0_93, %c0_94], %152 {strides = array<i32>} : memref<2x16x8x8xf32, #tpu.memory_space<vmem>>, vector<1x1x8x8xf32>,
    %153 = vector.extract_strided_slice %128 {offsets = [8, 0], sizes = [8, 8], strides = [1, 1]} : vector<32x16xf32> to vector<8x8xf32>
    %c1_95 = arith.constant 1 : index
    %c9_96 = arith.constant 9 : index
    %c0_97 = arith.constant 0 : index
    %c0_98 = arith.constant 0 : index
    %154 = vector.load %arg3[%c1_95, %c9_96, %c0_97, %c0_98] : memref<2x16x8x8xf32, #tpu.memory_space<vmem>>, vector<1x1x8x8xf32>
    %155 = vector.shape_cast %154 : vector<1x1x8x8xf32> to vector<8x8xf32>
    %156 = vector.shape_cast %153 : vector<8x8xf32> to vector<1x1x8x8xf32>
    tpu.vector_store %arg3[%c1_95, %c9_96, %c0_97, %c0_98], %156 {strides = array<i32>} : memref<2x16x8x8xf32, #tpu.memory_space<vmem>>, vector<1x1x8x8xf32>,
    %157 = vector.extract_strided_slice %128 {offsets = [8, 8], sizes = [8, 8], strides = [1, 1]} : vector<32x16xf32> to vector<8x8xf32>
    %c1_99 = arith.constant 1 : index
    %c13_100 = arith.constant 13 : index
    %c0_101 = arith.constant 0 : index
    %c0_102 = arith.constant 0 : index
    %158 = vector.load %arg3[%c1_99, %c13_100, %c0_101, %c0_102] : memref<2x16x8x8xf32, #tpu.memory_space<vmem>>, vector<1x1x8x8xf32>
    %159 = vector.shape_cast %158 : vector<1x1x8x8xf32> to vector<8x8xf32>
    %160 = vector.shape_cast %157 : vector<8x8xf32> to vector<1x1x8x8xf32>
    tpu.vector_store %arg3[%c1_99, %c13_100, %c0_101, %c0_102], %160 {strides = array<i32>} : memref<2x16x8x8xf32, #tpu.memory_space<vmem>>, vector<1x1x8x8xf32>,
    %161 = vector.extract_strided_slice %117 {offsets = [16, 0], sizes = [8, 8], strides = [1, 1]} : vector<32x16xf32> to vector<8x8xf32>
    %c1_103 = arith.constant 1 : index
    %c2_104 = arith.constant 2 : index
    %c0_105 = arith.constant 0 : index
    %c0_106 = arith.constant 0 : index
    %162 = vector.load %arg3[%c1_103, %c2_104, %c0_105, %c0_106] : memref<2x16x8x8xf32, #tpu.memory_space<vmem>>, vector<1x1x8x8xf32>
    %163 = vector.shape_cast %162 : vector<1x1x8x8xf32> to vector<8x8xf32>
    %164 = vector.shape_cast %161 : vector<8x8xf32> to vector<1x1x8x8xf32>
    tpu.vector_store %arg3[%c1_103, %c2_104, %c0_105, %c0_106], %164 {strides = array<i32>} : memref<2x16x8x8xf32, #tpu.memory_space<vmem>>, vector<1x1x8x8xf32>,
    %165 = vector.extract_strided_slice %117 {offsets = [16, 8], sizes = [8, 8], strides = [1, 1]} : vector<32x16xf32> to vector<8x8xf32>
    %c1_107 = arith.constant 1 : index
    %c6_108 = arith.constant 6 : index
    %c0_109 = arith.constant 0 : index
    %c0_110 = arith.constant 0 : index
    %166 = vector.load %arg3[%c1_107, %c6_108, %c0_109, %c0_110] : memref<2x16x8x8xf32, #tpu.memory_space<vmem>>, vector<1x1x8x8xf32>
    %167 = vector.shape_cast %166 : vector<1x1x8x8xf32> to vector<8x8xf32>
    %168 = vector.shape_cast %165 : vector<8x8xf32> to vector<1x1x8x8xf32>
    tpu.vector_store %arg3[%c1_107, %c6_108, %c0_109, %c0_110], %168 {strides = array<i32>} : memref<2x16x8x8xf32, #tpu.memory_space<vmem>>, vector<1x1x8x8xf32>,
    %169 = vector.extract_strided_slice %128 {offsets = [16, 0], sizes = [8, 8], strides = [1, 1]} : vector<32x16xf32> to vector<8x8xf32>
    %c1_111 = arith.constant 1 : index
    %c10_112 = arith.constant 10 : index
    %c0_113 = arith.constant 0 : index
    %c0_114 = arith.constant 0 : index
    %170 = vector.load %arg3[%c1_111, %c10_112, %c0_113, %c0_114] : memref<2x16x8x8xf32, #tpu.memory_space<vmem>>, vector<1x1x8x8xf32>
    %171 = vector.shape_cast %170 : vector<1x1x8x8xf32> to vector<8x8xf32>
    %172 = vector.shape_cast %169 : vector<8x8xf32> to vector<1x1x8x8xf32>
    tpu.vector_store %arg3[%c1_111, %c10_112, %c0_113, %c0_114], %172 {strides = array<i32>} : memref<2x16x8x8xf32, #tpu.memory_space<vmem>>, vector<1x1x8x8xf32>,
    %173 = vector.extract_strided_slice %128 {offsets = [16, 8], sizes = [8, 8], strides = [1, 1]} : vector<32x16xf32> to vector<8x8xf32>
    %c1_115 = arith.constant 1 : index
    %c14_116 = arith.constant 14 : index
    %c0_117 = arith.constant 0 : index
    %c0_118 = arith.constant 0 : index
    %174 = vector.load %arg3[%c1_115, %c14_116, %c0_117, %c0_118] : memref<2x16x8x8xf32, #tpu.memory_space<vmem>>, vector<1x1x8x8xf32>
    %175 = vector.shape_cast %174 : vector<1x1x8x8xf32> to vector<8x8xf32>
    %176 = vector.shape_cast %173 : vector<8x8xf32> to vector<1x1x8x8xf32>
    tpu.vector_store %arg3[%c1_115, %c14_116, %c0_117, %c0_118], %176 {strides = array<i32>} : memref<2x16x8x8xf32, #tpu.memory_space<vmem>>, vector<1x1x8x8xf32>,
    %177 = vector.extract_strided_slice %117 {offsets = [24, 0], sizes = [8, 8], strides = [1, 1]} : vector<32x16xf32> to vector<8x8xf32>
    %c1_119 = arith.constant 1 : index
    %c3_120 = arith.constant 3 : index
    %c0_121 = arith.constant 0 : index
    %c0_122 = arith.constant 0 : index
    %178 = vector.load %arg3[%c1_119, %c3_120, %c0_121, %c0_122] : memref<2x16x8x8xf32, #tpu.memory_space<vmem>>, vector<1x1x8x8xf32>
    %179 = vector.shape_cast %178 : vector<1x1x8x8xf32> to vector<8x8xf32>
    %180 = vector.shape_cast %177 : vector<8x8xf32> to vector<1x1x8x8xf32>
    tpu.vector_store %arg3[%c1_119, %c3_120, %c0_121, %c0_122], %180 {strides = array<i32>} : memref<2x16x8x8xf32, #tpu.memory_space<vmem>>, vector<1x1x8x8xf32>,
    %181 = vector.extract_strided_slice %117 {offsets = [24, 8], sizes = [8, 8], strides = [1, 1]} : vector<32x16xf32> to vector<8x8xf32>
    %c1_123 = arith.constant 1 : index
    %c7_124 = arith.constant 7 : index
    %c0_125 = arith.constant 0 : index
    %c0_126 = arith.constant 0 : index
    %182 = vector.load %arg3[%c1_123, %c7_124, %c0_125, %c0_126] : memref<2x16x8x8xf32, #tpu.memory_space<vmem>>, vector<1x1x8x8xf32>
    %183 = vector.shape_cast %182 : vector<1x1x8x8xf32> to vector<8x8xf32>
    %184 = vector.shape_cast %181 : vector<8x8xf32> to vector<1x1x8x8xf32>
    tpu.vector_store %arg3[%c1_123, %c7_124, %c0_125, %c0_126], %184 {strides = array<i32>} : memref<2x16x8x8xf32, #tpu.memory_space<vmem>>, vector<1x1x8x8xf32>,
    %185 = vector.extract_strided_slice %128 {offsets = [24, 0], sizes = [8, 8], strides = [1, 1]} : vector<32x16xf32> to vector<8x8xf32>
    %c1_127 = arith.constant 1 : index
    %c11_128 = arith.constant 11 : index
    %c0_129 = arith.constant 0 : index
    %c0_130 = arith.constant 0 : index
    %186 = vector.load %arg3[%c1_127, %c11_128, %c0_129, %c0_130] : memref<2x16x8x8xf32, #tpu.memory_space<vmem>>, vector<1x1x8x8xf32>
    %187 = vector.shape_cast %186 : vector<1x1x8x8xf32> to vector<8x8xf32>
    %188 = vector.shape_cast %185 : vector<8x8xf32> to vector<1x1x8x8xf32>
    tpu.vector_store %arg3[%c1_127, %c11_128, %c0_129, %c0_130], %188 {strides = array<i32>} : memref<2x16x8x8xf32, #tpu.memory_space<vmem>>, vector<1x1x8x8xf32>,
    %189 = vector.extract_strided_slice %128 {offsets = [24, 8], sizes = [8, 8], strides = [1, 1]} : vector<32x16xf32> to vector<8x8xf32>
    %c1_131 = arith.constant 1 : index
    %c15_132 = arith.constant 15 : index
    %c0_133 = arith.constant 0 : index
    %c0_134 = arith.constant 0 : index
    %190 = vector.load %arg3[%c1_131, %c15_132, %c0_133, %c0_134] : memref<2x16x8x8xf32, #tpu.memory_space<vmem>>, vector<1x1x8x8xf32>
    %191 = vector.shape_cast %190 : vector<1x1x8x8xf32> to vector<8x8xf32>
    %192 = vector.shape_cast %189 : vector<8x8xf32> to vector<1x1x8x8xf32>
    tpu.vector_store %arg3[%c1_131, %c15_132, %c0_133, %c0_134], %192 {strides = array<i32>} : memref<2x16x8x8xf32, #tpu.memory_space<vmem>>, vector<1x1x8x8xf32>,
    return
  }
  func.func @transform_0(%arg0: i32) -> (i32, i32, i32) {
    %c0_i32 = arith.constant 0 : i32
    %c0_i32_0 = arith.constant 0 : i32
    %c0_i32_1 = arith.constant 0 : i32
    return %arg0, %c0_i32, %c0_i32_0 : i32, i32, i32
  }
  func.func @transform_1(%arg0: i32) -> (i32, i32) {
    %c0_i32 = arith.constant 0 : i32
    %c0_i32_0 = arith.constant 0 : i32
    %c0_i32_1 = arith.constant 0 : i32
    return %c0_i32, %c0_i32_0 : i32, i32
  }
  func.func @transform_2(%arg0: i32) -> (i32, i32, i32, i32) {
    %c0_i32 = arith.constant 0 : i32
    %c0_i32_0 = arith.constant 0 : i32
    %c0_i32_1 = arith.constant 0 : i32
    %c0_i32_2 = arith.constant 0 : i32
    return %arg0, %c0_i32, %c0_i32_0, %c0_i32_1 : i32, i32, i32, i32
  }
}

</mosaic_0001>

<bundles_post_ra>
// kernel: tpu_custom_call.1
= control target key start
LH: loop header
LB: loop body
LE: loop exit
PB: predicated region body
PF: predicated region fallthrough
CT: control target
= control target key end

     0   :  { %7 = vsyncpa [#allocation3], 0  ;;  %s2333_s0 = inlined_call_operand.hbm [shape: f32[2,32,32], index: 0, kind: input, shape index: {}]   ;;  %s2334_s1 = inlined_call_operand.hbm [shape: f32[16,16], index: 1, kind: input, shape index: {}]   ;;  %s2335_s2 = inlined_call_operand.vmem [shape: f32[2,16,8,8], index: 2, kind: output, shape index: {}]  }
   0x1   :  { %8 = vsyncpa [#allocation5], 0  ;;  %s1914_s9 = smov [#allocation2]   ;;  %s1866_s13 = scalar_lea.hbm %s2333_s0, 1024 }
   0x2   :  { %s14_s10 = sshll.u32 %s1914_s9, 4  ;;  %p1867_p0 = scmp.ne.s32.totalorder %s2333_s0, %s1866_s13  ;;  %s15_s10 = int_to_ptr.vmem [resolvable:$true] %s14_s10 }
   0x3   :  { %p1870_p1 = scmp.lt.u32.totalorder %s1866_s13, %s2333_s0 }
   0x5   :  { %p1872_p2 = pnand %p1870_p1, %p1867_p0 }
   0x7   :  { %1875 = shalt.err (!%p1872_p2)
}
   0x8   :  { %s1876_s18 = scalar_lea.vmem %s15_s10, 1024  ;;  %p1881_p4 = scmp.lt.s32.totalorder %s15_s10, %s15_s10 }
   0x9   :  { %p1877_p3 = scmp.ne.s32.totalorder %s15_s10, %s1876_s18  ;;  %p1882_p5 = scmp.lt.s32.totalorder %s1876_s18, %s1876_s18 }
   0xb   :  { %p1883_p6 = por %p1882_p5, %p1881_p4 }
   0xd   :  { %p1884_p7 = pnand %p1883_p6, %p1877_p3 }
   0xf   :  { %1887 = shalt.err (!%p1884_p7)
}
  0x10   :  { %s1915_s19 = smov 128   ;;  %s1916_s20 = smov 8  }
  0x11   :  { %20 = dma.hbm_to_vmem [thread:$0]  %s2333_s0, 1024, %s15_s10, [#allocation3], %s1915_s19, %s1915_s19, %s1916_s20  }
  0x12   :  { %s1917_s23 = smov [#allocation4]   ;;  %s1888_s27 = scalar_lea.hbm %s2334_s1, 256 }
  0x13   :  { %s26_s24 = sshll.u32 %s1917_s23, 4  ;;  %p1889_p8 = scmp.ne.s32.totalorder %s2334_s1, %s1888_s27  ;;  %s27_s24 = int_to_ptr.vmem [resolvable:$true] %s26_s24 }
  0x14   :  { %p1892_p9 = scmp.lt.u32.totalorder %s1888_s27, %s2334_s1 }
  0x16   :  { %p1894_p10 = pnand %p1892_p9, %p1889_p8 }
  0x18   :  { %1897 = shalt.err (!%p1894_p10)
}
  0x19   :  { %s1898_s4 = scalar_lea.vmem %s27_s24, 256  ;;  %p1903_p12 = scmp.lt.s32.totalorder %s27_s24, %s27_s24 }
  0x1a   :  { %p1899_p11 = scmp.ne.s32.totalorder %s27_s24, %s1898_s4  ;;  %p1904_p13 = scmp.lt.s32.totalorder %s1898_s4, %s1898_s4 }
  0x1c   :  { %p1905_p0 = por %p1904_p13, %p1903_p12 }
  0x1e   :  { %p1906_p1 = pnand %p1905_p0, %p1899_p11 }
  0x20   :  { %1909 = shalt.err (!%p1906_p1)
}
  0x21   :  { %32 = dma.hbm_to_vmem [thread:$0]  %s2334_s1, 256, %s27_s24, [#allocation5], %s1915_s19, %s1915_s19, %s1916_s20  }
  0x22   :  { %1910 = dma.done.wait [#allocation3], 1024  }
  0x23   :  { %1911 = vsyncadd [#allocation3], 4294966272 }
  0x24   :  { %1912 = dma.done.wait [#allocation5], 256  }
  0x25   :  { %1913 = vsyncadd [#allocation5], 4294967040  ;;  %v43_v0 = vld [vmem:[#allocation2 + $0x10] sm:$0xff]  ;;  %v41_v1 = vld [vmem:[#allocation2] sm:$0xff]  ;;  %s1918_s6 = smov 112   ;;  %vm97_vm0 = vcmask 130048  }
  0x26   :  { %53 = vrot.lane.b32.xlu1 %v43_v0, %s1918_s6  ;;  %49 = vrot.lane.b32.xlu0 %v41_v1, %s1918_s6  ;;  %v44_v2 = vld [vmem:[#allocation2 + $0x18] sm:$0xff]  ;;  %v42_v3 = vld [vmem:[#allocation2 + $0x8] sm:$0xff]  ;;  %v39_v4 = vld [vmem:[#allocation4] sm:$0xff]  ;;  %vm708_vm1 = vcmask 64512   ;;  %s1919_s8 = smov 120  }
  0x27   :  { %v40_v5 = vld [vmem:[#allocation4 + $0x8] sm:$0xff]  ;;  %v1963_v8 = vld [vmem:[#allocation2 + $0x20] sm:$0xff]  ;;  %v1973_v9 = vld [vmem:[#allocation2 + $0x38] sm:$0xff] }
  0x28   :  { %v1959_v6 = vpack.c.bf16 %v40_v5, %v39_v4  ;;  %v1961_v7 = vld [vmem:[#allocation2 + $0x28] sm:$0xff]  ;;  %v1975_v10 = vld [vmem:[#allocation2 + $0x30] sm:$0xff] }
  0x2a   :  { %55 = vrot.lane.b32.xlu1 %v44_v2, %s1918_s6  ;;  %51 = vrot.lane.b32.xlu0 %v42_v3, %s1918_s6 }
  0x2b   :  { %1781 = vmatprep.subr.bf16.mxu0 %v1959_v6  ;;  %1793 = vmatprep.subr.bf16.mxu1 %v1959_v6 }
  0x2c   :  { %1783 = vmatpush3.bf16.msra.mxu0 %v1959_v6  ;;  %1795 = vmatpush3.bf16.msra.mxu1 %v1959_v6 }
  0x2d   :  { %1785 = vmatprep.subr.bf16.mxu0 %v1959_v6  ;;  %1797 = vmatprep.subr.bf16.mxu1 %v1959_v6 }
  0x2e   :  { %783 = vrot.lane.b32.xlu1 %v1961_v7, %s1918_s6  ;;  %781 = vrot.lane.b32.xlu0 %v1963_v8, %s1918_s6 }
  0x32   :  { %787 = vrot.lane.b32.xlu1 %v1973_v9, %s1918_s6  ;;  %785 = vrot.lane.b32.xlu0 %v1975_v10, %s1918_s6 }
  0x98   :  { %v54_v11 = vpop.permute.xlu1 %53  ;;  %v50_v12 = vpop.permute.xlu0 %49 }
  0x99   :  { %v63_v13 = vadd.f32 %v54_v11, %v43_v0  ;;  %v71_v14 = vsub.f32 %v43_v0, %v54_v11  ;;  %v61_v15 = vadd.f32 %v50_v12, %v41_v1  ;;  %v69_v16 = vsub.f32 %v41_v1, %v50_v12 }
  0x9b   :  { %v67_v17 = vmul.f32 0.25, %v63_v13  ;;  %v75_v18 = vmul.f32 0.25, %v71_v14  ;;  %v65_v25 = vmul.f32 0.25, %v61_v15  ;;  %v73_v26 = vmul.f32 0.25, %v69_v16 }
  0x9c   :  { %v56_v19 = vpop.permute.xlu1 %55  ;;  %v52_v20 = vpop.permute.xlu0 %51 }
  0x9d   :  { %v64_v21 = vadd.f32 %v56_v19, %v44_v2  ;;  %v72_v22 = vsub.f32 %v44_v2, %v56_v19  ;;  %v62_v23 = vadd.f32 %v52_v20, %v42_v3  ;;  %v70_v24 = vsub.f32 %v42_v3, %v52_v20 }
  0x9f   :  { %v68_v27 = vmul.f32 0.25, %v64_v21  ;;  %v76_v28 = vmul.f32 0.25, %v72_v22  ;;  %v66_v29 = vmul.f32 0.25, %v62_v23  ;;  %v74_v30 = vmul.f32 0.25, %v70_v24 }
  0xa0   :  { %v784_v47 = vpop.permute.xlu1 %783  ;;  %v782_v48 = vpop.permute.xlu0 %781 }
  0xa1   :  { %v1979_v31 = vpack.c.bf16 %v68_v27, %v67_v17  ;;  %v1981_v32 = vpack.c.bf16 %v76_v28, %v75_v18  ;;  %v1983_v33 = vpack.c.bf16 %v66_v29, %v65_v25  ;;  %v1985_v34 = vpack.c.bf16 %v74_v30, %v73_v26 }
  0xa2   :  { %v794_v55 = vadd.f32 %v784_v47, %v1961_v7  ;;  %v793_v56 = vadd.f32 %v782_v48, %v1963_v8  ;;  %v802_v59 = vsub.f32 %v1961_v7, %v784_v47  ;;  %v801_v60 = vsub.f32 %v1963_v8, %v782_v48 }
  0xa3   :  { %v81_v35 = vunpack.c.l.bf16 %v1979_v31  ;;  %v82_v36 = vunpack.c.h.bf16 %v1979_v31  ;;  %v397_v37 = vunpack.c.l.bf16 %v1981_v32  ;;  %v398_v38 = vunpack.c.h.bf16 %v1981_v32 }
  0xa4   :  { %v79_v39 = vunpack.c.l.bf16 %v1983_v33  ;;  %v80_v40 = vunpack.c.h.bf16 %v1983_v33  ;;  %v395_v41 = vunpack.c.l.bf16 %v1985_v34  ;;  %v396_v42 = vunpack.c.h.bf16 %v1985_v34  ;;  %v788_v1 = vpop.permute.xlu1 %787  ;;  %v786_v2 = vpop.permute.xlu0 %785 }
  0xa5   :  { %v1997_v43 = vsub.f32 %v67_v17, %v81_v35  ;;  %v2001_v44 = vsub.f32 %v68_v27, %v82_v36  ;;  %v2005_v45 = vsub.f32 %v75_v18, %v397_v37  ;;  %v2009_v46 = vsub.f32 %v76_v28, %v398_v38 }
  0xa6   :  { %v2013_v49 = vsub.f32 %v66_v29, %v80_v40  ;;  %v2017_v50 = vsub.f32 %v74_v30, %v396_v42  ;;  %v83_v51 = vsub.f32 %v65_v25, %v79_v39  ;;  %v399_v52 = vsub.f32 %v73_v26, %v395_v41 }
  0xa7   :  { %v2029_v57 = vpack.c.bf16 %v2001_v44, %v1997_v43  ;;  %v2033_v58 = vpack.c.bf16 %v2009_v46, %v2005_v45  ;;  %v798_v3 = vmul.f32 0.25, %v794_v55  ;;  %v797_v4 = vmul.f32 0.25, %v793_v56 }
  0xa8   :  { %v2020_v53 = vpack.c.bf16 %v2013_v49, %v83_v51  ;;  %v2023_v54 = vpack.c.bf16 %v2017_v50, %v399_v52  ;;  %v806_v5 = vmul.f32 0.25, %v802_v59  ;;  %v805_v7 = vmul.f32 0.25, %v801_v60 }
  0xa9   :  { %v91_v8 = vunpack.c.l.bf16 %v2029_v57  ;;  %v407_v11 = vunpack.c.l.bf16 %v2033_v58  ;;  %v796_v12 = vadd.f32 %v788_v1, %v1973_v9  ;;  %v804_v13 = vsub.f32 %v1973_v9, %v788_v1 }
  0xaa   :  { %v89_v61 = vunpack.c.l.bf16 %v2020_v53  ;;  %v90_v62 = vunpack.c.h.bf16 %v2020_v53  ;;  %v405_v63 = vunpack.c.l.bf16 %v2023_v54  ;;  %v406_v0 = vunpack.c.h.bf16 %v2023_v54 }
  0xab   :  { %v795_v14 = vadd.f32 %v786_v2, %v1975_v10  ;;  %v92_v15 = vunpack.c.h.bf16 %v2029_v57  ;;  %v408_v16 = vunpack.c.h.bf16 %v2033_v58  ;;  %v2058_v17 = vpack.c.bf16 %v798_v3, %v797_v4 }
  0xac   :  { %1664 = vmatprep.mubr.msk.f32.mxu0 %vm97_vm0, %v89_v61  ;;  %1694 = vmatprep.mubr.msk.f32.mxu1 %vm97_vm0, %v405_v63  ;;  %v803_v18 = vsub.f32 %v1975_v10, %v786_v2  ;;  %v2063_v19 = vpack.c.bf16 %v806_v5, %v805_v7  ;;  %v800_v20 = vmul.f32 0.25, %v796_v12  ;;  %v808_v21 = vmul.f32 0.25, %v804_v13 }
  0xad   :  { %1665 = vmatmul.mubr.msk.f32.vlgmr.msra.gmra.mrb[0].mxu0 %vm97_vm0, %v90_v62  ;;  %1695 = vmatmul.mubr.msk.f32.vlgmr.msra.gmra.mrb[0].mxu1 %vm97_vm0, %v406_v0  ;;  %v799_v9 = vmul.f32 0.25, %v795_v14  ;;  %v811_v10 = vunpack.c.l.bf16 %v2058_v17  ;;  %v812_v23 = vunpack.c.h.bf16 %v2058_v17  ;;  %v93_v28 = vsub.f32 %v83_v51, %v89_v61 }
  0xae   :  { %1787 = vmatpush3.bf16.msra.mxu0 %v1959_v6  ;;  %1799 = vmatpush3.bf16.msra.mxu1 %v1959_v6  ;;  %v807_v22 = vmul.f32 0.25, %v803_v18  ;;  %v1126_v24 = vunpack.c.l.bf16 %v2063_v19  ;;  %v1127_v25 = vunpack.c.h.bf16 %v2063_v19  ;;  %v409_v29 = vsub.f32 %v399_v52, %v405_v63 }
  0xaf   :  { %1667 = vmatprep.mubr.msk.f32.mxu0 %vm97_vm0, %v91_v8  ;;  %1697 = vmatprep.mubr.msk.f32.mxu1 %vm97_vm0, %v407_v11  ;;  %v2075_v26 = vpack.c.bf16 %v800_v20, %v799_v9  ;;  %v2092_v30 = vsub.f32 %v797_v4, %v811_v10  ;;  %v2096_v33 = vsub.f32 %v798_v3, %v812_v23 }
  0xb0   :  { %1789 = vmatprep.subr.bf16.mxu0 %v1959_v6  ;;  %1801 = vmatprep.subr.bf16.mxu1 %v1959_v6  ;;  %v2080_v27 = vpack.c.bf16 %v808_v21, %v807_v22  ;;  %v2104_v34 = vsub.f32 %v805_v7, %v1126_v24  ;;  %v410_v31 = vsub.f32 %v2017_v50, %v406_v0 }
  0xb1   :  { %1668 = vmatmul.mubr.msk.f32.gmra.mrb[2].mxu0 %vm97_vm0, %v92_v15  ;;  %1698 = vmatmul.mubr.msk.f32.gmra.mrb[2].mxu1 %vm97_vm0, %v408_v16  ;;  %v95_v48 = vsub.f32 %v1997_v43, %v91_v8  ;;  %v411_v50 = vsub.f32 %v2005_v45, %v407_v11  ;;  %v96_v52 = vsub.f32 %v2001_v44, %v92_v15 }
  0xb2   :  { %1674 = vmatprep.mubr.msk.f32.mxu0 %vm97_vm0, %v79_v39  ;;  %1704 = vmatprep.mubr.msk.f32.mxu1 %vm97_vm0, %v395_v41  ;;  %v813_v39 = vunpack.c.l.bf16 %v2075_v26  ;;  %v1129_v41 = vunpack.c.h.bf16 %v2080_v27  ;;  %v412_v53 = vsub.f32 %v2009_v46, %v408_v16 }
  0xb4   :  { %v817_v47 = vsub.f32 %v799_v9, %v813_v39 }
  0xb5   :  { %1675 = vmatmul.mubr.msk.f32.vlgmr.msra.gmra.mrb[0].mxu0 %vm97_vm0, %v80_v40  ;;  %1705 = vmatmul.mubr.msk.f32.vlgmr.msra.gmra.mrb[0].mxu1 %vm97_vm0, %v396_v42  ;;  %v814_v40 = vunpack.c.h.bf16 %v2075_v26  ;;  %v94_v42 = vsub.f32 %v2013_v49, %v90_v62  ;;  %v1133_v49 = vsub.f32 %v808_v21, %v1129_v41 }
  0xb6   :  { %1791 = vmatpush3.bf16.msra.mxu0 %v1959_v6  ;;  %1803 = vmatpush3.bf16.msra.mxu1 %v1959_v6 }
  0xb7   :  { %1677 = vmatprep.mubr.msk.f32.mxu0 %vm97_vm0, %v81_v35  ;;  %1707 = vmatprep.mubr.msk.f32.mxu1 %vm97_vm0, %v397_v37  ;;  %v2108_v35 = vsub.f32 %v806_v5, %v1127_v25  ;;  %v1128_v37 = vunpack.c.l.bf16 %v2080_v27 }
  0xb8   :  { %1805 = vmatprep.subr.bf16.mxu0 %v1959_v6  ;;  %1817 = vmatprep.subr.bf16.mxu1 %v1959_v6 }
  0xb9   :  { %1678 = vmatmul.mubr.msk.f32.gmra.mrb[2].mxu0 %vm97_vm0, %v82_v36  ;;  %1708 = vmatmul.mubr.msk.f32.gmra.mrb[2].mxu1 %vm97_vm0, %v398_v38  ;;  %v819_v36 = vpack.c.bf16 %v2096_v33, %v2092_v30  ;;  %v1134_v32 = vpack.c.bf16 %v2108_v35, %v2104_v34  ;;  %v818_v38 = vsub.f32 %v800_v20, %v814_v40 }
  0xba   :  { %1684 = vmatprep.mubr.msk.f32.mxu0 %vm97_vm0, %v93_v28  ;;  %1714 = vmatprep.mubr.msk.f32.mxu1 %vm97_vm0, %v409_v29  ;;  %v1132_v51 = vsub.f32 %v807_v22, %v1128_v37 }
  0xbb   :  { %v821_v54 = vunpack.c.l.bf16 %v819_v36  ;;  %v1136_v43 = vunpack.c.l.bf16 %v1134_v32  ;;  %v820_v55 = vpack.c.bf16 %v818_v38, %v817_v47  ;;  %v822_v44 = vunpack.c.h.bf16 %v819_v36 }
  0xbc   :  { %v1135_v45 = vpack.c.bf16 %v1133_v49, %v1132_v51  ;;  %v1137_v46 = vunpack.c.h.bf16 %v1134_v32 }
  0xbd   :  { %1685 = vmatmul.mubr.msk.f32.vlgmr.msra.gmra.mrb[0].mxu0 %vm97_vm0, %v94_v42  ;;  %1715 = vmatmul.mubr.msk.f32.vlgmr.msra.gmra.mrb[0].mxu1 %vm97_vm0, %v410_v31  ;;  %v823_v56 = vunpack.c.l.bf16 %v820_v55  ;;  %v824_v58 = vunpack.c.h.bf16 %v820_v55  ;;  %v825_v60 = vsub.f32 %v2092_v30, %v821_v54  ;;  %v1140_v61 = vsub.f32 %v2104_v34, %v1136_v43 }
  0xbe   :  { %1807 = vmatpush3.bf16.msra.mxu0 %v1959_v6  ;;  %1819 = vmatpush3.bf16.msra.mxu1 %v1959_v6  ;;  %v1138_v57 = vunpack.c.l.bf16 %v1135_v45  ;;  %v1139_v59 = vunpack.c.h.bf16 %v1135_v45  ;;  %v826_v62 = vsub.f32 %v2096_v33, %v822_v44 }
  0xbf   :  { %1687 = vmatprep.mubr.msk.f32.mxu0 %vm97_vm0, %v95_v48  ;;  %1717 = vmatprep.mubr.msk.f32.mxu1 %vm97_vm0, %v411_v50  ;;  %v827_v63 = vsub.f32 %v817_v47, %v823_v56  ;;  %v828_v1 = vsub.f32 %v818_v38, %v824_v58 }
  0xc0   :  { %1809 = vmatprep.subr.bf16.mxu0 %v1959_v6  ;;  %1821 = vmatprep.subr.bf16.mxu1 %v1959_v6  ;;  %v1142_v0 = vsub.f32 %v1132_v51, %v1138_v57  ;;  %v1143_v2 = vsub.f32 %v1133_v49, %v1139_v59 }
  0xc1   :  { %1688 = vmatmul.mubr.msk.f32.gmra.mrb[2].mxu0 %vm97_vm0, %v96_v52  ;;  %1718 = vmatmul.mubr.msk.f32.gmra.mrb[2].mxu1 %vm97_vm0, %v412_v53 }
  0xc2   :  { %1724 = vmatprep.mubr.msk.f32.mxu0 %vm97_vm0, %v821_v54  ;;  %1754 = vmatprep.mubr.msk.f32.mxu1 %vm97_vm0, %v1136_v43 }
  0xc5   :  { %1725 = vmatmul.mubr.msk.f32.vlgmr.msra.gmra.mrb[4].mxu0 %vm97_vm0, %v822_v44  ;;  %1755 = vmatmul.mubr.msk.f32.vlgmr.msra.gmra.mrb[4].mxu1 %vm97_vm0, %v1137_v46 }
  0xc6   :  { %1811 = vmatpush3.bf16.msra.mxu0 %v1959_v6  ;;  %1823 = vmatpush3.bf16.msra.mxu1 %v1959_v6 }
  0xc7   :  { %1727 = vmatprep.mubr.msk.f32.mxu0 %vm97_vm0, %v823_v56  ;;  %1757 = vmatprep.mubr.msk.f32.mxu1 %vm97_vm0, %v1138_v57 }
  0xc8   :  { %1813 = vmatprep.subr.bf16.mxu0 %v1959_v6  ;;  %1825 = vmatprep.subr.bf16.mxu1 %v1959_v6 }
  0xc9   :  { %1728 = vmatmul.mubr.msk.f32.gmra.mrb[6].mxu0 %vm97_vm0, %v824_v58  ;;  %1758 = vmatmul.mubr.msk.f32.gmra.mrb[6].mxu1 %vm97_vm0, %v1139_v59 }
  0xca   :  { %1734 = vmatprep.mubr.msk.f32.mxu0 %vm97_vm0, %v811_v10  ;;  %1764 = vmatprep.mubr.msk.f32.mxu1 %vm97_vm0, %v1126_v24 }
  0xcd   :  { %1735 = vmatmul.mubr.msk.f32.vlgmr.msra.gmra.mrb[4].mxu0 %vm97_vm0, %v812_v23  ;;  %1765 = vmatmul.mubr.msk.f32.vlgmr.msra.gmra.mrb[4].mxu1 %vm97_vm0, %v1127_v25 }
  0xce   :  { %1815 = vmatpush3.bf16.msra.mxu0 %v1959_v6  ;;  %1827 = vmatpush3.bf16.msra.mxu1 %v1959_v6  ;;  %v1141_v6 = vsub.f32 %v2108_v35, %v1137_v46 }
  0xcf   :  { %1737 = vmatprep.mubr.msk.f32.mxu0 %vm97_vm0, %v813_v39  ;;  %1767 = vmatprep.mubr.msk.f32.mxu1 %vm97_vm0, %v1128_v37 }
  0xd1   :  { %1738 = vmatmul.mubr.msk.f32.gmra.mrb[6].mxu0 %vm97_vm0, %v814_v40  ;;  %1768 = vmatmul.mubr.msk.f32.gmra.mrb[6].mxu1 %vm97_vm0, %v1129_v41 }
  0xd2   :  { %1744 = vmatprep.mubr.msk.f32.mxu0 %vm97_vm0, %v825_v60  ;;  %1774 = vmatprep.mubr.msk.f32.mxu1 %vm97_vm0, %v1140_v61 }
  0xd5   :  { %1745 = vmatmul.mubr.msk.f32.vlgmr.msra.gmra.mrb[4].mxu0 %vm97_vm0, %v826_v62  ;;  %1775 = vmatmul.mubr.msk.f32.vlgmr.msra.gmra.mrb[4].mxu1 %vm97_vm0, %v1141_v6 }
  0xd6   :  { %1747 = vmatprep.mubr.msk.f32.mxu0 %vm97_vm0, %v827_v63  ;;  %1777 = vmatprep.mubr.msk.f32.mxu1 %vm97_vm0, %v1142_v0 }
  0xd9   :  { %1748 = vmatmul.mubr.msk.f32.gmra.mrb[6].mxu0 %vm97_vm0, %v828_v1  ;;  %1778 = vmatmul.mubr.msk.f32.gmra.mrb[6].mxu1 %vm97_vm0, %v1143_v2 }
 0x190   :  { %v1686_v3 = vpop.f32.mrb[0].mxu0  ;;  %v1716_v4 = vpop.f32.mrb[0].mxu1 }
 0x191   :  { %1536 = vst.msk [vmem:[%s2335_s2 + $0x8] sm:$0xff] %vm708_vm1, %v1686_v3  ;;  %727 = vrot.lane.b32.xlu0 %v1686_v3, %s1919_s8  ;;  %v370_v5 = vpop.f32.mrb[1].mxu0  ;;  %1538 = vst.msk [vmem:[%s2335_s2 + $0x48] sm:$0xff] %vm708_vm1, %v1716_v4  ;;  %735 = vrot.lane.b32.xlu1 %v1716_v4, %s1919_s8  ;;  %v685_v7 = vpop.f32.mrb[1].mxu1 }
 0x192   :  { %709 = vst.msk [vmem:[%s2335_s2] sm:$0xff] %vm708_vm1, %v370_v5  ;;  %1534 = vst.msk [vmem:[%s2335_s2 + $0x40] sm:$0xff] %vm708_vm1, %v685_v7 }
 0x194   :  { %v1689_v8 = vpop.f32.mrb[2].mxu0  ;;  %v1719_v11 = vpop.f32.mrb[2].mxu1 }
 0x195   :  { %1544 = vst.msk [vmem:[%s2335_s2 + $0x18] sm:$0xff] %vm708_vm1, %v1689_v8  ;;  %711 = vrot.lane.b32.xlu0 %v370_v5, %s1919_s8  ;;  %v380_v12 = vpop.f32.mrb[3].mxu0  ;;  %1546 = vst.msk [vmem:[%s2335_s2 + $0x58] sm:$0xff] %vm708_vm1, %v1719_v11  ;;  %719 = vrot.lane.b32.xlu1 %v685_v7, %s1919_s8  ;;  %v695_v13 = vpop.f32.mrb[3].mxu1 }
 0x196   :  { %1540 = vst.msk [vmem:[%s2335_s2 + $0x10] sm:$0xff] %vm708_vm1, %v380_v12  ;;  %1542 = vst.msk [vmem:[%s2335_s2 + $0x50] sm:$0xff] %vm708_vm1, %v695_v13 }
 0x199   :  { %759 = vrot.lane.b32.xlu0 %v1689_v8, %s1919_s8  ;;  %767 = vrot.lane.b32.xlu1 %v1719_v11, %s1919_s8 }
 0x19d   :  { %743 = vrot.lane.b32.xlu0 %v380_v12, %s1919_s8  ;;  %751 = vrot.lane.b32.xlu1 %v695_v13, %s1919_s8 }
 0x1a8   :  { %v1746_v14 = vpop.f32.mrb[4].mxu0  ;;  %v1776_v15 = vpop.f32.mrb[4].mxu1 }
 0x1a9   :  { %1576 = vst.msk [vmem:[%s2335_s2 + $0x88] sm:$0xff] %vm708_vm1, %v1746_v14  ;;  %1458 = vrot.lane.b32.xlu0 %v1746_v14, %s1919_s8  ;;  %v1101_v16 = vpop.f32.mrb[5].mxu0  ;;  %1578 = vst.msk [vmem:[%s2335_s2 + $0xc8] sm:$0xff] %vm708_vm1, %v1776_v15  ;;  %1466 = vrot.lane.b32.xlu1 %v1776_v15, %s1919_s8  ;;  %v1416_v17 = vpop.f32.mrb[5].mxu1 }
 0x1aa   :  { %1572 = vst.msk [vmem:[%s2335_s2 + $0x80] sm:$0xff] %vm708_vm1, %v1101_v16  ;;  %1574 = vst.msk [vmem:[%s2335_s2 + $0xc0] sm:$0xff] %vm708_vm1, %v1416_v17 }
 0x1ac   :  { %v1749_v18 = vpop.f32.mrb[6].mxu0  ;;  %v1779_v19 = vpop.f32.mrb[6].mxu1 }
 0x1ad   :  { %1584 = vst.msk [vmem:[%s2335_s2 + $0x98] sm:$0xff] %vm708_vm1, %v1749_v18  ;;  %1442 = vrot.lane.b32.xlu0 %v1101_v16, %s1919_s8  ;;  %v1111_v20 = vpop.f32.mrb[7].mxu0  ;;  %1586 = vst.msk [vmem:[%s2335_s2 + $0xd8] sm:$0xff] %vm708_vm1, %v1779_v19  ;;  %1450 = vrot.lane.b32.xlu1 %v1416_v17, %s1919_s8  ;;  %v1426_v9 = vpop.f32.mrb[7].mxu1 }
 0x1ae   :  { %1580 = vst.msk [vmem:[%s2335_s2 + $0x90] sm:$0xff] %vm708_vm1, %v1111_v20  ;;  %1582 = vst.msk [vmem:[%s2335_s2 + $0xd0] sm:$0xff] %vm708_vm1, %v1426_v9 }
 0x1b1   :  { %1474 = vrot.lane.b32.xlu0 %v1111_v20, %s1919_s8  ;;  %1482 = vrot.lane.b32.xlu1 %v1426_v9, %s1919_s8 }
 0x1b5   :  { %1490 = vrot.lane.b32.xlu0 %v1749_v18, %s1919_s8  ;;  %1498 = vrot.lane.b32.xlu1 %v1779_v19, %s1919_s8 }
 0x203   :  { %v728_v21 = vpop.permute.xlu0 %727  ;;  %v736_v22 = vpop.permute.xlu1 %735 }
 0x204   :  { %1537 = vst.msk [vmem:[%s2335_s2 + $0x28] sm:$0xff] %vm708_vm1, %v728_v21  ;;  %1539 = vst.msk [vmem:[%s2335_s2 + $0x68] sm:$0xff] %vm708_vm1, %v736_v22 }
 0x207   :  { %v712_v10 = vpop.permute.xlu0 %711  ;;  %v720_v23 = vpop.permute.xlu1 %719 }
 0x208   :  { %1533 = vst.msk [vmem:[%s2335_s2 + $0x20] sm:$0xff] %vm708_vm1, %v712_v10  ;;  %1535 = vst.msk [vmem:[%s2335_s2 + $0x60] sm:$0xff] %vm708_vm1, %v720_v23 }
 0x20b   :  { %v760_v24 = vpop.permute.xlu0 %759  ;;  %v768_v25 = vpop.permute.xlu1 %767 }
 0x20c   :  { %1545 = vst.msk [vmem:[%s2335_s2 + $0x38] sm:$0xff] %vm708_vm1, %v760_v24  ;;  %1547 = vst.msk [vmem:[%s2335_s2 + $0x78] sm:$0xff] %vm708_vm1, %v768_v25 }
 0x20f   :  { %v744_v26 = vpop.permute.xlu0 %743  ;;  %v752_v27 = vpop.permute.xlu1 %751 }
 0x210   :  { %1541 = vst.msk [vmem:[%s2335_s2 + $0x30] sm:$0xff] %vm708_vm1, %v744_v26  ;;  %1543 = vst.msk [vmem:[%s2335_s2 + $0x70] sm:$0xff] %vm708_vm1, %v752_v27 }
 0x21b   :  { %v1459_v28 = vpop.permute.xlu0 %1458  ;;  %v1467_v29 = vpop.permute.xlu1 %1466 }
 0x21c   :  { %1577 = vst.msk [vmem:[%s2335_s2 + $0xa8] sm:$0xff] %vm708_vm1, %v1459_v28  ;;  %1579 = vst.msk [vmem:[%s2335_s2 + $0xe8] sm:$0xff] %vm708_vm1, %v1467_v29 }
 0x21f   :  { %v1443_v30 = vpop.permute.xlu0 %1442  ;;  %v1451_v33 = vpop.permute.xlu1 %1450 }
 0x220   :  { %1573 = vst.msk [vmem:[%s2335_s2 + $0xa0] sm:$0xff] %vm708_vm1, %v1443_v30  ;;  %1575 = vst.msk [vmem:[%s2335_s2 + $0xe0] sm:$0xff] %vm708_vm1, %v1451_v33 }
 0x223   :  { %v1475_v34 = vpop.permute.xlu0 %1474  ;;  %v1483_v35 = vpop.permute.xlu1 %1482 }
 0x224   :  { %1581 = vst.msk [vmem:[%s2335_s2 + $0xb0] sm:$0xff] %vm708_vm1, %v1475_v34  ;;  %1583 = vst.msk [vmem:[%s2335_s2 + $0xf0] sm:$0xff] %vm708_vm1, %v1483_v35 }
 0x227   :  { %v1491_v39 = vpop.permute.xlu0 %1490  ;;  %v1499_v40 = vpop.permute.xlu1 %1498 }
 0x228   :  { %1585 = vst.msk [vmem:[%s2335_s2 + $0xb8] sm:$0xff] %vm708_vm1, %v1491_v39  ;;  %1587 = vst.msk [vmem:[%s2335_s2 + $0xf8] sm:$0xff] %vm708_vm1, %v1499_v40 }
 0x229   :  { %1507 = vsyncpa [#allocation3], 1 }
 0x22a   :  { %1508 = vsyncpa [#allocation5], 1 }

</bundles_post_ra>
